<compile_context>
chip_gen: v7x
topology: tpu7x:2x2x1
jax: 0.10.0
libtpu: 0.0.40
codegen_flags: <defaults>
</compile_context>

<pallas_src>
import math
from functools import partial

import jax
import jax.numpy as jnp
from jax.experimental import pallas as pl
from jax.experimental.pallas import tpu as pltpu

EPS = 1e-5
DTYPE = jnp.float32


# ----------------------------------------------------------------------------
# Fused Pallas kernel
# ----------------------------------------------------------------------------

def _bottleneck_kernel(x_ref, s1_ref, h1_ref, w1_ref, s2_ref, h2_ref, w2_ref,
                       o_ref, *, L):
    """Fused BN1+ReLU+Conv1(k=1)  ->  BN2+ReLU+Conv2(k=3, pad=1).

    x_ref : (B*L, Cin)        channels-last, batch folded into rows
    s*/h* : (1, C)            folded BatchNorm scale / shift
    w1_ref: (Cin, inter)      conv1 weight (kernel_size=1)
    w2_ref: (3*inter, Cpad)   conv2 weight in im2col layout, lane-padded Cout
    o_ref : (B*L, Cpad)       lane-dense output (new channels only)
    """
    rows = x_ref.shape[0]
    inter = w1_ref.shape[1]

    # BN1 + ReLU + 1x1 conv  (one MXU matmul: M=B*L, K=Cin, N=inter)
    a1 = jnp.maximum(x_ref[...] * s1_ref[...] + h1_ref[...], 0.0)
    h = jnp.dot(a1, w1_ref[...], preferred_element_type=jnp.float32)

    # BN2 + ReLU
    a2 = jnp.maximum(h * s2_ref[...] + h2_ref[...], 0.0)

    # im2col for the k=3, pad=1 conv.  Row r = b*L + t; the taps are
    # a2[t-1], a2[t], a2[t+1] with zeros outside each image.  The boundary
    # mask is applied to the *shifted* copies (conv zero-padding acts on the
    # activated signal), entirely in VMEM -- no wrapper-side padding.
    t = jax.lax.broadcasted_iota(jnp.int32, (rows, inter), 0) % L
    zrow = jnp.zeros((1, inter), jnp.float32)
    a_prev = jnp.concatenate([zrow, a2[:rows - 1]], axis=0)      # -> a2[t-1]
    a_prev = jnp.where(t > 0, a_prev, 0.0)
    a_next = jnp.concatenate([a2[1:], zrow], axis=0)             # -> a2[t+1]
    a_next = jnp.where(t < L - 1, a_next, 0.0)
    im2col = jnp.concatenate([a_prev, a2, a_next], axis=-1)      # (B*L, 3*inter)

    # single MXU matmul: K = 3*inter, N = lane-dense padded Cout
    out = jnp.dot(im2col, w2_ref[...], preferred_element_type=jnp.float32)
    o_ref[...] = out.astype(o_ref.dtype)


# ----------------------------------------------------------------------------
# Parameters (PyTorch-equivalent shapes) + host-side preparation
# ----------------------------------------------------------------------------

def init_params(key, in_planes, out_planes):
    """Random parameters for BottleneckBlock (BatchNorm in inference mode)."""
    inter = out_planes * 4
    ks = jax.random.split(key, 4)

    def bn_p(k, c):
        k1, k2, k3, k4 = jax.random.split(k, 4)
        return dict(
            g=1.0 + 0.1 * jax.random.normal(k1, (c,), DTYPE),
            b=0.1 * jax.random.normal(k2, (c,), DTYPE),
            m=0.1 * jax.random.normal(k3, (c,), DTYPE),
            v=jax.random.uniform(k4, (c,), DTYPE, 0.5, 1.5),
        )

    w1 = jax.random.normal(ks[0], (inter, in_planes, 1), DTYPE) * math.sqrt(2.0 / (1 * inter))
    w2 = jax.random.normal(ks[1], (out_planes, inter, 3), DTYPE) * math.sqrt(2.0 / (3 * out_planes))
    return dict(bn1=bn_p(ks[2], in_planes), bn2=bn_p(ks[3], inter), w1=w1, w2=w2)


def prepare_kernel_params(params, out_planes):
    """Host-side prep: fold BN into scale/shift, put conv weights into matmul
    layout, and lane-pad the k=3 conv's output channels to a multiple of 128."""
    inter = out_planes * 4

    def fold(bn):
        scale = bn["g"] / jnp.sqrt(bn["v"] + EPS)
        shift = bn["b"] - bn["m"] * scale
        return scale.reshape(1, -1).astype(DTYPE), shift.reshape(1, -1).astype(DTYPE)

    s1, h1 = fold(params["bn1"])
    s2, h2 = fold(params["bn2"])
    w1m = jnp.transpose(params["w1"][:, :, 0])                         # (Cin, inter)
    w2m = jnp.transpose(params["w2"], (2, 1, 0)).reshape(3 * inter, out_planes)
    cpad = 128 * pl.cdiv(out_planes, 128)                              # lane-dense N
    w2m = jnp.pad(w2m, ((0, 0), (0, cpad - out_planes)))
    return dict(s1=s1, h1=h1, w1m=w1m, s2=s2, h2=h2, w2m=w2m)


# ----------------------------------------------------------------------------
# Forward pass (wrapper: layout transposes + final channel concat only)
# ----------------------------------------------------------------------------

def bottleneck_forward(x_bcl, kp, out_planes):
    """x_bcl: (B, Cin, L) in PyTorch Conv1d layout -> (B, Cin + out_planes, L)."""
    B, Cin, L = x_bcl.shape
    cpad = kp["w2m"].shape[1]
    x2d = jnp.transpose(x_bcl, (0, 2, 1)).reshape(B * L, Cin).astype(DTYPE)

    out_pad = pl.pallas_call(
        partial(_bottleneck_kernel, L=L),
        out_shape=jax.ShapeDtypeStruct((B * L, cpad), DTYPE),
        in_specs=[pl.BlockSpec(memory_space=pltpu.MemorySpace.VMEM)] * 7,
        out_specs=pl.BlockSpec(memory_space=pltpu.MemorySpace.VMEM),
    )(x2d, kp["s1"], kp["h1"], kp["w1m"], kp["s2"], kp["h2"], kp["w2m"])

    out = out_pad[:, :out_planes].reshape(B, L, out_planes)
    out_bcl = jnp.transpose(out, (0, 2, 1))
    return jnp.concatenate([x_bcl.astype(DTYPE), out_bcl], axis=1)     # torch.cat(dim=1)


# ----------------------------------------------------------------------------
# Pure-JAX reference (mirrors the PyTorch module) for correctness check
# ----------------------------------------------------------------------------

def reference_forward(x, params):
    hp = jax.lax.Precision.HIGHEST

    def bn(y, p):
        inv = p["g"] / jnp.sqrt(p["v"] + EPS)
        return (y - p["m"][None, :, None]) * inv[None, :, None] + p["b"][None, :, None]

    a1 = jnp.maximum(bn(x, params["bn1"]), 0.0)
    h = jnp.einsum("bcl,oc->bol", a1, params["w1"][:, :, 0], precision=hp)
    a2 = jnp.maximum(bn(h, params["bn2"]), 0.0)
    a2p = jnp.pad(a2, ((0, 0), (0, 0), (1, 1)))
    L = x.shape[-1]
    out = sum(jnp.einsum("bcl,oc->bol", a2p[:, :, j:j + L], params["w2"][:, :, j],
                         precision=hp) for j in range(3))
    return jnp.concatenate([x, out], axis=1)


if __name__ == "__main__":
    key = jax.random.PRNGKey(0)
    kp_key, kx_key = jax.random.split(key)

    B, in_planes, L = 2, 16, 16
    out_planes = 8                       # inter_planes = 4 * out_planes = 32

    params = init_params(kp_key, in_planes, out_planes)
    kparams = prepare_kernel_params(params, out_planes)

    # PyTorch Conv1d / BatchNorm1d input layout: (N, C, L)
    x = jax.random.normal(kx_key, (B, in_planes, L), DTYPE)

    fwd = jax.jit(lambda xx: bottleneck_forward(xx, kparams, out_planes))
    y = fwd(x)
    jax.block_until_ready(y)

    assert y.shape == (B, in_planes + out_planes, L), y.shape
    assert bool(jnp.all(jnp.isfinite(y)))

    # correctness against a pure-JAX reference of the PyTorch forward
    y_ref = reference_forward(x, params)
    err = float(jnp.max(jnp.abs(y - y_ref)))
    scale = max(float(jnp.max(jnp.abs(y_ref))), 1.0)
    assert err <= 1e-2 * scale, (err, scale)

    print("KERNEL_OK")
</pallas_src>

<mosaic_0001>
module attributes {stable_mosaic.version = 11 : i64} {
  func.func @_bottleneck_kernel(%arg0: memref<32x16xf32, #tpu.memory_space<vmem>>, %arg1: memref<1x16xf32, #tpu.memory_space<vmem>>, %arg2: memref<1x16xf32, #tpu.memory_space<vmem>>, %arg3: memref<16x32xf32, #tpu.memory_space<vmem>>, %arg4: memref<1x32xf32, #tpu.memory_space<vmem>>, %arg5: memref<1x32xf32, #tpu.memory_space<vmem>>, %arg6: memref<96x128xf32, #tpu.memory_space<vmem>>, %arg7: memref<32x128xf32, #tpu.memory_space<vmem>>) attributes {dimension_semantics = [], scalar_prefetch = 0 : i64, scratch_operands = 0 : i64, tpu.core_type = #tpu.core_type<tc>} {
    %c0 = arith.constant 0 : index
    %c0_0 = arith.constant 0 : index
    %0 = vector.load %arg0[%c0, %c0_0] : memref<32x16xf32, #tpu.memory_space<vmem>>, vector<32x16xf32>
    %c0_1 = arith.constant 0 : index
    %c0_2 = arith.constant 0 : index
    %1 = vector.load %arg1[%c0_1, %c0_2] : memref<1x16xf32, #tpu.memory_space<vmem>>, vector<1x16xf32>
    %2 = vector.broadcast %1 : vector<1x16xf32> to vector<32x16xf32>
    %3 = arith.mulf %0, %2 : vector<32x16xf32>
    %c0_3 = arith.constant 0 : index
    %c0_4 = arith.constant 0 : index
    %4 = vector.load %arg2[%c0_3, %c0_4] : memref<1x16xf32, #tpu.memory_space<vmem>>, vector<1x16xf32>
    %5 = vector.broadcast %4 : vector<1x16xf32> to vector<32x16xf32>
    %6 = arith.addf %3, %5 : vector<32x16xf32>
    %cst = arith.constant 0.000000e+00 : f32
    %7 = vector.broadcast %cst : f32 to vector<32x16xf32>
    %8 = arith.maximumf %6, %7 : vector<32x16xf32>
    %c0_5 = arith.constant 0 : index
    %c0_6 = arith.constant 0 : index
    %9 = vector.load %arg3[%c0_5, %c0_6] : memref<16x32xf32, #tpu.memory_space<vmem>>, vector<16x32xf32>
    %cst_7 = arith.constant dense<0.000000e+00> : vector<32x32xf32>
    %10 = tpu.matmul %8, %9, %cst_7 {dimension_numbers = #tpu.dot_dimension_numbers<[1], [0], [0], [1], [0, 0, 1, 1], [], []>} : vector<32x16xf32>, vector<16x32xf32>, vector<32x32xf32> -> vector<32x32xf32>
    %c0_8 = arith.constant 0 : index
    %c0_9 = arith.constant 0 : index
    %11 = vector.load %arg4[%c0_8, %c0_9] : memref<1x32xf32, #tpu.memory_space<vmem>>, vector<1x32xf32>
    %12 = vector.broadcast %11 : vector<1x32xf32> to vector<32x32xf32>
    %13 = arith.mulf %10, %12 : vector<32x32xf32>
    %c0_10 = arith.constant 0 : index
    %c0_11 = arith.constant 0 : index
    %14 = vector.load %arg5[%c0_10, %c0_11] : memref<1x32xf32, #tpu.memory_space<vmem>>, vector<1x32xf32>
    %15 = vector.broadcast %14 : vector<1x32xf32> to vector<32x32xf32>
    %16 = arith.addf %13, %15 : vector<32x32xf32>
    %cst_12 = arith.constant 0.000000e+00 : f32
    %17 = vector.broadcast %cst_12 : f32 to vector<32x32xf32>
    %18 = arith.maximumf %16, %17 : vector<32x32xf32>
    %19 = tpu.iota {dimensions = array<i32: 0>} : vector<32x32xi32>
    %c16_i32 = arith.constant 16 : i32
    %c0_i32 = arith.constant 0 : i32
    %20 = arith.cmpi eq, %c16_i32, %c0_i32 : i32
    %c1_i32 = arith.constant 1 : i32
    %21 = arith.select %20, %c1_i32, %c16_i32 : i32
    %22 = vector.broadcast %21 : i32 to vector<32x32xi32>
    %23 = arith.remsi %19, %22 : vector<32x32xi32>
    %c0_i32_13 = arith.constant 0 : i32
    %24 = vector.broadcast %c0_i32_13 : i32 to vector<32x32xi32>
    %25 = arith.cmpi ne, %23, %24 : vector<32x32xi32>
    %c0_i32_14 = arith.constant 0 : i32
    %26 = vector.broadcast %c0_i32_14 : i32 to vector<32x32xi32>
    %27 = arith.cmpi slt, %23, %26 : vector<32x32xi32>
    %c0_i32_15 = arith.constant 0 : i32
    %28 = arith.cmpi slt, %21, %c0_i32_15 : i32
    %29 = vector.broadcast %28 : i1 to vector<32x32xi1>
    %30 = vector.broadcast %29 : vector<32x32xi1> to vector<32x32xi1>
    %31 = arith.xori %27, %30 : vector<32x32xi1>
    %32 = arith.andi %31, %25 : vector<32x32xi1>
    %33 = vector.broadcast %21 : i32 to vector<32x32xi32>
    %34 = arith.addi %23, %33 : vector<32x32xi32>
    %35 = arith.select %32, %34, %23 : vector<32x32xi1>, vector<32x32xi32>
    %cst_16 = arith.constant 0.000000e+00 : f32
    %36 = vector.broadcast %cst_16 : f32 to vector<1x32xf32>
    %37 = vector.extract_strided_slice %18 {offsets = [0, 0], sizes = [31, 32], strides = [1, 1]} : vector<32x32xf32> to vector<31x32xf32>
    %38 = tpu.concatenate %36, %37 in 0 : vector<1x32xf32>, vector<31x32xf32> -> vector<32x32xf32>
    %c0_i32_17 = arith.constant 0 : i32
    %39 = vector.broadcast %c0_i32_17 : i32 to vector<32x32xi32>
    %40 = arith.cmpi sgt, %35, %39 : vector<32x32xi32>
    %cst_18 = arith.constant 0.000000e+00 : f32
    %41 = vector.broadcast %cst_18 : f32 to vector<32x32xf32>
    %42 = arith.select %40, %38, %41 : vector<32x32xi1>, vector<32x32xf32>
    %43 = vector.extract_strided_slice %18 {offsets = [1, 0], sizes = [31, 32], strides = [1, 1]} : vector<32x32xf32> to vector<31x32xf32>
    %44 = tpu.concatenate %43, %36 in 0 : vector<31x32xf32>, vector<1x32xf32> -> vector<32x32xf32>
    %c15_i32 = arith.constant 15 : i32
    %45 = vector.broadcast %c15_i32 : i32 to vector<32x32xi32>
    %46 = arith.cmpi slt, %35, %45 : vector<32x32xi32>
    %cst_19 = arith.constant 0.000000e+00 : f32
    %47 = vector.broadcast %cst_19 : f32 to vector<32x32xf32>
    %48 = arith.select %46, %44, %47 : vector<32x32xi1>, vector<32x32xf32>
    %49 = tpu.concatenate %42, %18, %48 in 1 : vector<32x32xf32>, vector<32x32xf32>, vector<32x32xf32> -> vector<32x96xf32>
    %c0_20 = arith.constant 0 : index
    %c0_21 = arith.constant 0 : index
    %50 = vector.load %arg6[%c0_20, %c0_21] : memref<96x128xf32, #tpu.memory_space<vmem>>, vector<96x128xf32>
    %cst_22 = arith.constant dense<0.000000e+00> : vector<32x128xf32>
    %51 = tpu.matmul %49, %50, %cst_22 {dimension_numbers = #tpu.dot_dimension_numbers<[1], [0], [0], [1], [0, 0, 1, 1], [], []>} : vector<32x96xf32>, vector<96x128xf32>, vector<32x128xf32> -> vector<32x128xf32>
    %c0_23 = arith.constant 0 : index
    %c0_24 = arith.constant 0 : index
    %52 = vector.load %arg7[%c0_23, %c0_24] : memref<32x128xf32, #tpu.memory_space<vmem>>, vector<32x128xf32>
    tpu.vector_store %arg7[%c0_23, %c0_24], %51 {strides = array<i32>} : memref<32x128xf32, #tpu.memory_space<vmem>>, vector<32x128xf32>,
    return
  }
}

</mosaic_0001>

<bundles_post_ra>
// kernel: _lambda_.1
= control target key start
LH: loop header
LB: loop body
LE: loop exit
PB: predicated region body
PF: predicated region fallthrough
CT: control target
= control target key end

     0   :  { %12 = vsyncpa [#allocation3], 0  ;;  %s583_s24 = smov [#allocation2]   ;;  %s714_s0 = inlined_call_operand.vmem [shape: f32[32,16], index: 0, kind: input, shape index: {}]   ;;  %s715_s1 = inlined_call_operand.vmem [shape: f32[1,16], index: 1, kind: input, shape index: {}]   ;;  %s716_s2 = inlined_call_operand.vmem [shape: f32[1,16], index: 2, kind: input, shape index: {}]   ;;  %s717_s3 = inlined_call_operand.vmem [shape: f32[16,32], index: 3, kind: input, shape index: {}]   ;;  %s718_s4 = inlined_call_operand.vmem [shape: f32[1,32], index: 4, kind: input, shape index: {}]   ;;  %s719_s5 = inlined_call_operand.vmem [shape: f32[1,32], index: 5, kind: input, shape index: {}]   ;;  %s720_s6 = inlined_call_operand.hbm [shape: f32[96,128], index: 6, kind: input, shape index: {}]   ;;  %s721_s7 = inlined_call_operand.vmem [shape: f32[32,128], index: 7, kind: output, shape index: {}]  }
   0x1   :  { %s30_s25 = sshll.u32 %s583_s24, 4  ;;  %s559_s28 = scalar_lea.hbm %s720_s6, 1536  ;;  %s31_s25 = int_to_ptr.vmem [resolvable:$true] %s30_s25 }
   0x2   :  { %p560_p0 = scmp.ne.s32.totalorder %s720_s6, %s559_s28  ;;  %p563_p1 = scmp.lt.u32.totalorder %s559_s28, %s720_s6 }
   0x4   :  { %p565_p2 = pnand %p563_p1, %p560_p0 }
   0x6   :  { %568 = shalt.err (!%p565_p2)
}
   0x7   :  { %s569_s10 = scalar_lea.vmem %s31_s25, 1536  ;;  %p574_p4 = scmp.lt.s32.totalorder %s31_s25, %s31_s25 }
   0x8   :  { %p570_p3 = scmp.ne.s32.totalorder %s31_s25, %s569_s10  ;;  %p575_p5 = scmp.lt.s32.totalorder %s569_s10, %s569_s10 }
   0xa   :  { %p576_p6 = por %p575_p5, %p574_p4 }
   0xc   :  { %p577_p7 = pnand %p576_p6, %p570_p3 }
   0xe   :  { %580 = shalt.err (!%p577_p7)
}
   0xf   :  { %s584_s11 = smov 128   ;;  %s585_s12 = smov 8  }
  0x10   :  { %36 = dma.hbm_to_vmem [thread:$0]  %s720_s6, 1536, %s31_s25, [#allocation3], %s584_s11, %s584_s11, %s585_s12  }
  0x11   :  { %581 = dma.done.wait [#allocation3], 1536  }
  0x12   :  { %582 = vsyncadd [#allocation3], 4294965760  ;;  %v70_v0 = vld [vmem:[%s717_s3] sm:$0xff]  ;;  %v71_v1 = vld [vmem:[%s717_s3 + $0x8] sm:$0xff]  ;;  %vm72_vm0 = vcmask 130048   ;;  %v196_v33 = vlaneseq  ;;  %vm274_vm1 = vcmask 1046528  }
  0x13   :  { %v40_v2 = vld [vmem:[%s714_s0] sm:$0xff]  ;;  %v526_v3 = vpack.c.bf16 %v71_v1, %v70_v0  ;;  %v41_v6 = vld [vmem:[%s714_s0 + $0x8] sm:$0xff]  ;;  %v42_v9 = vld [vmem:[%s714_s0 + $0x10] sm:$0xff]  ;;  %vm253_vm2 = vcmask 1040384   ;;  %vm328_vm7 = vcmask 523264   ;;  %vm323_vm8 = vcmask 261120  }
  0x14   :  { %v452_v4 = vld [vmem:[%s715_s1] ss:$0 sm:$0xff]  ;;  %v43_v10 = vld [vmem:[%s714_s0 + $0x18] sm:$0xff]  ;;  %v334_v22 = vld [vmem:[#allocation2 + $0x8] sm:$0xff]  ;;  %v197_v40 = vshrl.u32 %v196_v33, 7  ;;  %vm345_vm9 = vcmask 785408  }
  0x15   :  { %v453_v5 = vld [vmem:[%s716_s2] ss:$0 sm:$0xff]  ;;  %v51_v7 = vmul.f32 %v452_v4, %v40_v2  ;;  %v52_v8 = vmul.f32 %v452_v4, %v41_v6  ;;  %527 = vmatprep.subr.bf16.mxu0 %v526_v3  ;;  %v53_v11 = vmul.f32 %v452_v4, %v42_v9  ;;  %v54_v12 = vmul.f32 %v452_v4, %v43_v10  ;;  %v335_v23 = vld [vmem:[#allocation2 + $0x10] sm:$0xff]  ;;  %v336_v25 = vld [vmem:[#allocation2 + $0x18] sm:$0xff] }
  0x16   :  { %529 = vmatpush3.bf16.msra.mxu0 %v526_v3  ;;  %v333_v21 = vld [vmem:[#allocation2] sm:$0xff]  ;;  %v534_v26 = vpack.c.bf16 %v336_v25, %v335_v23  ;;  %v338_v28 = vld [vmem:[#allocation2 + $0x28] sm:$0xff]  ;;  %v339_v30 = vld [vmem:[#allocation2 + $0x30] sm:$0xff]  ;;  %v205_v50 = vand.u32 15, %v197_v40  ;;  %v198_v54 = vadd.s32 8, %v197_v40  ;;  %v199_v55 = vadd.s32 16, %v197_v40 }
  0x17   :  { %v62_v13 = vadd.f32 %v453_v5, %v51_v7  ;;  %v63_v14 = vadd.f32 %v453_v5, %v52_v8  ;;  %v64_v15 = vadd.f32 %v453_v5, %v53_v11  ;;  %v65_v16 = vadd.f32 %v453_v5, %v54_v12  ;;  %v337_v27 = vld [vmem:[#allocation2 + $0x20] sm:$0xff]  ;;  %v340_v31 = vld [vmem:[#allocation2 + $0x38] sm:$0xff]  ;;  %v342_v35 = vld [vmem:[#allocation2 + $0x48] sm:$0xff] }
  0x18   :  { %v530_v24 = vpack.c.bf16 %v334_v22, %v333_v21  ;;  %v538_v29 = vpack.c.bf16 %v338_v28, %v337_v27  ;;  %v542_v32 = vpack.c.bf16 %v340_v31, %v339_v30  ;;  %v341_v34 = vld [vmem:[#allocation2 + $0x40] sm:$0xff]  ;;  %v343_v43 = vld [vmem:[#allocation2 + $0x50] sm:$0xff]  ;;  %v344_v44 = vld [vmem:[#allocation2 + $0x58] sm:$0xff]  ;;  %vm670_vm3 = vcmp.gt.s32.totalorder %v205_v50, 0 }
  0x19   :  { %v66_v17 = vmax.f32 %v62_v13, 0.0  ;;  %v67_v18 = vmax.f32 %v63_v14, 0.0  ;;  %v68_v19 = vmax.f32 %v64_v15, 0.0  ;;  %v69_v20 = vmax.f32 %v65_v16, 0.0  ;;  %v458_v37 = vld [vmem:[%s718_s4] ss:$0 sm:$0xff] }
  0x1a   :  { %531 = vmatprep.subr.bf16.mxu1 %v530_v24  ;;  %v546_v36 = vpack.c.bf16 %v342_v35, %v341_v34  ;;  %v459_v39 = vld [vmem:[%s719_s5] ss:$0 sm:$0xff]  ;;  %v550_v46 = vpack.c.bf16 %v344_v44, %v343_v43  ;;  %s586_s4 = smov 32   ;;  %v212_v2 = vand.u32 15, %v198_v54  ;;  %v219_v3 = vand.u32 15, %v199_v55  ;;  %s587_s5 = smov 64  }
  0x1b   :  { %490 = vmatprep.mubr.msk.f32.mxu0 %vm72_vm0, %v66_v17  ;;  %533 = vmatpush3.bf16.msra.mxu1 %v530_v24  ;;  %v200_v10 = vadd.s32 24, %v197_v40 }
  0x1c   :  { %491 = vmatmul.mubr.msk.f32.vlgmr.msra.gmra.mrb[0].mxu0 %vm72_vm0, %v67_v18  ;;  %535 = vmatprep.subr.bf16.mxu1 %v534_v26  ;;  %vm679_vm4 = vcmp.gt.s32.totalorder %v219_v3, 0  ;;  %vm288_vm5 = vcmp.lt.s32.totalorder %v212_v2, 15 }
  0x1d   :  { %493 = vmatprep.mubr.msk.f32.mxu0 %vm72_vm0, %v68_v19  ;;  %v226_v18 = vand.u32 15, %v200_v10 }
  0x1f   :  { %537 = vmatpush3.bf16.msra.mxu1 %v534_v26  ;;  %vm290_vm6 = vcmp.lt.s32.totalorder %v226_v18, 15 }
  0x20   :  { %494 = vmatmul.mubr.msk.f32.gmra.mrb[2].mxu0 %vm72_vm0, %v69_v20  ;;  %539 = vmatprep.subr.bf16.mxu1 %v538_v29 }
  0x23   :  { %541 = vmatpush3.bf16.msra.mxu1 %v538_v29 }
  0x24   :  { %543 = vmatprep.subr.bf16.mxu1 %v542_v32 }
  0x27   :  { %545 = vmatpush3.bf16.msra.mxu1 %v542_v32 }
  0x28   :  { %547 = vmatprep.subr.bf16.mxu1 %v546_v36 }
  0x2b   :  { %549 = vmatpush3.bf16.msra.mxu1 %v546_v36 }
  0x2c   :  { %551 = vmatprep.subr.bf16.mxu1 %v550_v46 }
  0x2f   :  { %553 = vmatpush3.bf16.msra.mxu1 %v550_v46 }
  0xef   :  { %v492_v38 = vpop.f32.mrb[0].mxu0 }
  0xf0   :  { %v178_v41 = vmul.f32 %v492_v38, %v458_v37  ;;  %v151_v42 = vpop.f32.mrb[1].mxu0 }
  0xf1   :  { %v177_v45 = vmul.f32 %v458_v37, %v151_v42 }
  0xf2   :  { %v189_v47 = vadd.f32 %v459_v39, %v178_v41 }
  0xf3   :  { %v188_v48 = vadd.f32 %v459_v39, %v177_v45  ;;  %v495_v49 = vpop.f32.mrb[2].mxu0 }
  0xf4   :  { %v193_v51 = vmax.f32 %v189_v47, 0.0  ;;  %v180_v52 = vmul.f32 %v495_v49, %v458_v37  ;;  %v161_v53 = vpop.f32.mrb[3].mxu0 }
  0xf5   :  { %v192_v56 = vmax.f32 %v188_v48, 0.0  ;;  %v179_v57 = vmul.f32 %v458_v37, %v161_v53 }
  0xf6   :  { %v255_v58 = vrot.slane %v193_v51, 7  ;;  %v191_v59 = vadd.f32 %v459_v39, %v180_v52  ;;  %297 = vrot.lane.b32.xlu0 %v193_v51, %s586_s4  ;;  %v276_v60 = vrot.slane %v193_v51, 1 }
  0xf7   :  { %v254_v61 = vrot.slane %v192_v56, 7  ;;  %v190_v62 = vadd.f32 %v459_v39, %v179_v57  ;;  %v275_v63 = vrot.slane %v192_v56, 1 }
  0xf8   :  { %v195_v1 = vmax.f32 %v191_v59, 0.0 }
  0xf9   :  { %v194_v4 = vmax.f32 %v190_v62, 0.0  ;;  %v277_v5 = vsel %vm274_vm1, %v275_v63, %v276_v60  ;;  %v256_v6 = vsel %vm253_vm2, %v254_v61, %v255_v58  ;;  %v265_v7 = vsel %vm253_vm2, 0.0, %v254_v61 }
  0xfa   :  { %v259_v8 = vrot.slane %v195_v1, 7  ;;  %295 = vrot.lane.b32.xlu0 %v192_v56, %s586_s4  ;;  %311 = vrot.lane.b32.xlu1 %v277_v5, %s587_s5  ;;  %v280_v9 = vrot.slane %v195_v1, 1  ;;  %v270_v11 = vsel %vm670_vm3, %v265_v7, 0.0 }
  0xfb   :  { %v257_v12 = vrot.slane %v194_v4, 7  ;;  %v278_v13 = vrot.slane %v194_v4, 1 }
  0xfc   :  { %v286_v22 = vsel %vm274_vm1, %v280_v9, 0.0 }
  0xfd   :  { %v281_v15 = vsel %vm274_vm1, %v278_v13, %v280_v9  ;;  %v279_v16 = vsel %vm274_vm1, %v276_v60, %v278_v13  ;;  %v260_v17 = vsel %vm253_vm2, %v257_v12, %v259_v8  ;;  %v258_v19 = vsel %vm253_vm2, %v255_v58, %v257_v12 }
  0xfe   :  { %301 = vrot.lane.b32.xlu1 %v195_v1, %s586_s4  ;;  %299 = vrot.lane.b32.xlu0 %v194_v4, %s586_s4  ;;  %v272_v20 = vsel %vm679_vm4, %v258_v19, 0.0  ;;  %v292_v21 = vsel %vm288_vm5, %v279_v16, 0.0  ;;  %v294_v23 = vsel %vm290_vm6, %v286_v22, 0.0 }
 0x102   :  { %315 = vrot.lane.b32.xlu0 %v281_v15, %s587_s5  ;;  %313 = vrot.lane.b32.xlu1 %v292_v21, %s587_s5 }
 0x106   :  { %317 = vrot.lane.b32.xlu1 %v294_v23, %s587_s5 }
 0x168   :  { %v298_v24 = vpop.permute.xlu0 %297 }
 0x169   :  { %v325_v31 = vsel %vm323_vm8, %v256_v6, %v298_v24 }
 0x16c   :  { %v296_v25 = vpop.permute.xlu0 %295  ;;  %v312_v26 = vpop.permute.xlu1 %311 }
 0x16d   :  { %v324_v27 = vsel %vm323_vm8, %v270_v11, %v296_v25 }
 0x16e   :  { %v329_v28 = vsel %vm328_vm7, %v324_v27, %v312_v26 }
 0x16f   :  { %520 = vmatprep.mubr.msk.f32.mxu1 %vm345_vm9, %v329_v28 }
 0x170   :  { %v302_v29 = vpop.permute.xlu1 %301  ;;  %v300_v30 = vpop.permute.xlu0 %299 }
 0x171   :  { %v326_v32 = vsel %vm323_vm8, %v272_v20, %v300_v30  ;;  %v327_v37 = vsel %vm323_vm8, %v260_v17, %v302_v29 }
 0x174   :  { %v316_v33 = vpop.permute.xlu0 %315  ;;  %v314_v34 = vpop.permute.xlu1 %313 }
 0x175   :  { %v331_v35 = vsel %vm328_vm7, %v326_v32, %v316_v33  ;;  %v330_v36 = vsel %vm328_vm7, %v325_v31, %v314_v34 }
 0x176   :  { %521 = vmatmul.mubr.msk.f32.vlgmr.msra.gmra.mrb[0].mxu1 %vm345_vm9, %v330_v36 }
 0x177   :  { %523 = vmatprep.mubr.msk.f32.mxu1 %vm345_vm9, %v331_v35 }
 0x178   :  { %v318_v38 = vpop.permute.xlu1 %317 }
 0x179   :  { %v332_v39 = vsel %vm328_vm7, %v327_v37, %v318_v38 }
 0x17a   :  { %524 = vmatmul.mubr.msk.f32.gmra.mrb[2].mxu1 %vm345_vm9, %v332_v39 }
 0x249   :  { %v522_v40 = vpop.f32.mrb[0].mxu1 }
 0x24a   :  { %444 = vst [vmem:[%s721_s7 + $0x8] sm:$0xff] %v522_v40  ;;  %v424_v41 = vpop.f32.mrb[1].mxu1 }
 0x24b   :  { %443 = vst [vmem:[%s721_s7] sm:$0xff] %v424_v41 }
 0x24d   :  { %v525_v42 = vpop.f32.mrb[2].mxu1 }
 0x24e   :  { %446 = vst [vmem:[%s721_s7 + $0x18] sm:$0xff] %v525_v42  ;;  %v434_v43 = vpop.f32.mrb[3].mxu1 }
 0x24f   :  { %445 = vst [vmem:[%s721_s7 + $0x10] sm:$0xff] %v434_v43 }
 0x250   :  { %451 = vsyncpa [#allocation3], 1 }

</bundles_post_ra>
